<compile_context>
chip_gen: v7x
topology: tpu7x:2x2x1
jax: 0.10.0
libtpu: 0.0.40
codegen_flags: <defaults>
</compile_context>

<pallas_src>
import functools

import jax
import jax.numpy as jnp
from jax import lax
from jax.experimental import pallas as pl
from jax.experimental.pallas import tpu as pltpu


def bert_embeddings_kernel(word_ids_smem,     # (N,) int32, SMEM (scalar prefetch)
                           type_ids_ref,      # (tile, 1) int32, VMEM
                           wtab_hbm,          # (V, H) f32, HBM (pl.ANY)
                           ptab_ref,          # (tile, H) f32, VMEM (seq-tile slice)
                           ttab_ref,          # (T, H) f32, VMEM (full, tiny)
                           gamma_ref,         # (1, H) f32, VMEM
                           beta_ref,          # (1, H) f32, VMEM
                           out_ref,           # (tile, H) f32, VMEM
                           rows_ref,          # (tile, H) f32, VMEM scratch (gather dst)
                           sem,               # DMA semaphore, shape (1,)
                           *, eps, tile, seq_tiles):
    b = pl.program_id(0)
    j = pl.program_id(1)
    base = (b * seq_tiles + j) * tile      # first flattened token of this tile

    # 1) Kick off the word-row gather: one HBM->VMEM DMA per token in the tile.
    @pl.loop(0, tile)
    def _issue(t):
        wid = word_ids_smem[base + t]
        pltpu.make_async_copy(
            wtab_hbm.at[pl.ds(wid, 1), :],
            rows_ref.at[pl.ds(t, 1), :],
            sem.at[0],
        ).start()

    # 2) While the DMAs are in flight: position embedding (already the correct
    #    (tile, H) slice via BlockSpec, no gather) + token-type embedding via
    #    a VPU select over the tiny type table (no MXU matmul).
    acc = ptab_ref[...]
    tt_ids = type_ids_ref[...]                           # (tile, 1) int32
    num_types = ttab_ref.shape[0]
    for t in range(num_types):                           # static tiny loop (T == 2)
        mask = (tt_ids == t).astype(jnp.float32)         # (tile, 1)
        acc = acc + mask * ttab_ref[t:t + 1, :]          # broadcast against (1, H)

    # 3) Wait for all gathered word rows, then add them.
    @pl.loop(0, tile)
    def _wait(t):
        pltpu.make_async_copy(
            wtab_hbm.at[pl.ds(0, 1), :],                 # dummy descriptor, same shape
            rows_ref.at[pl.ds(0, 1), :],
            sem.at[0],
        ).wait()
    acc = acc + rows_ref[...]

    # 4) LayerNorm over the hidden axis (BertLayerNorm semantics):
    #    u = mean(x); s = mean((x-u)^2); y = gamma * (x-u)/sqrt(s+eps) + beta
    mean = jnp.mean(acc, axis=-1, keepdims=True)
    centered = acc - mean
    var = jnp.mean(centered * centered, axis=-1, keepdims=True)
    normed = centered * lax.rsqrt(var + eps)
    out_ref[...] = normed * gamma_ref[...] + beta_ref[...]


def bert_embeddings(input_ids, token_type_ids=None, position_ids=None, params=None,
                    *, eps=1e-12, token_tile=128):
    """input_ids / token_type_ids: (B, S) int32.  position_ids must be None
    (module-default arange path)."""
    B, S = input_ids.shape
    wtab = params["word_embeddings"]            # (V, H)   -- stays in HBM
    ptab = params["position_embeddings"]        # (P, H)
    ttab = params["token_type_embeddings"]      # (T, H)
    gamma = params["layer_norm_gamma"].reshape(1, -1).astype(jnp.float32)
    beta = params["layer_norm_beta"].reshape(1, -1).astype(jnp.float32)
    H = wtab.shape[1]

    if token_type_ids is None:
        token_type_ids = jnp.zeros_like(input_ids)
    assert position_ids is None, "only the default arange position_ids path is implemented"
    assert S % token_tile == 0, "seq length must be a multiple of token_tile"
    assert ptab.shape[0] >= S, "max_position_embeddings must cover the sequence"
    assert H % 128 == 0, "hidden must be lane-dense (multiple of 128)"

    seq_tiles = S // token_tile
    N = B * S

    word_ids = input_ids.reshape(N).astype(jnp.int32)            # SMEM scalar prefetch
    type_ids = token_type_ids.reshape(N, 1).astype(jnp.int32)    # per-tile VMEM stream

    kernel = functools.partial(bert_embeddings_kernel, eps=eps,
                               tile=token_tile, seq_tiles=seq_tiles)

    out = pl.pallas_call(
        kernel,
        out_shape=jax.ShapeDtypeStruct((N, H), jnp.float32),
        grid_spec=pltpu.PrefetchScalarGridSpec(
            num_scalar_prefetch=1,
            grid=(B, seq_tiles),
            in_specs=[
                # token_type ids for this tile (needed as a vector for the select)
                pl.BlockSpec((token_tile, 1),
                             lambda b, j, ids: (b * seq_tiles + j, 0)),
                # word table: HBM-resident, rows gathered by manual DMA
                pl.BlockSpec(memory_space=pl.ANY),
                # position table: contiguous (tile, H) slice per seq tile
                pl.BlockSpec((token_tile, H), lambda b, j, ids: (j, 0)),
                # tiny full tables / LN params
                pl.BlockSpec(ttab.shape, lambda b, j, ids: (0, 0)),
                pl.BlockSpec((1, H), lambda b, j, ids: (0, 0)),
                pl.BlockSpec((1, H), lambda b, j, ids: (0, 0)),
            ],
            out_specs=pl.BlockSpec((token_tile, H),
                                   lambda b, j, ids: (b * seq_tiles + j, 0)),
            scratch_shapes=[
                pltpu.VMEM((token_tile, H), jnp.float32),   # gathered word rows
                pltpu.SemaphoreType.DMA((1,)),              # gather completion sem
            ],
        ),
        compiler_params=pltpu.CompilerParams(
            dimension_semantics=("parallel", "parallel")),
    )(word_ids, type_ids, wtab, ptab, ttab, gamma, beta)

    return out.reshape(B, S, H)


def init_params(key, vocab_size, hidden_size, max_position_embeddings,
                type_vocab_size):
    k1, k2, k3 = jax.random.split(key, 3)
    word = 0.02 * jax.random.normal(k1, (vocab_size, hidden_size), jnp.float32)
    # padding_idx=0 in nn.Embedding -> row 0 is zeros.
    word = word.at[0].set(0.0)
    pos = 0.02 * jax.random.normal(k2, (max_position_embeddings, hidden_size),
                                   jnp.float32)
    typ = 0.02 * jax.random.normal(k3, (type_vocab_size, hidden_size),
                                   jnp.float32)
    gamma = jnp.ones((hidden_size,), jnp.float32)
    beta = jnp.zeros((hidden_size,), jnp.float32)
    return {
        "word_embeddings": word,
        "position_embeddings": pos,
        "token_type_embeddings": typ,
        "layer_norm_gamma": gamma,
        "layer_norm_beta": beta,
    }


if __name__ == "__main__":
    # Small (but lane-dense / tile-friendly) synthetic config.
    B, S, H = 2, 256, 128
    VOCAB, MAX_POS, TYPE_VOCAB = 512, 256, 2
    EPS = 1e-12

    key = jax.random.PRNGKey(0)
    k_param, k_ids, k_tt = jax.random.split(key, 3)

    params = init_params(k_param, VOCAB, H, MAX_POS, TYPE_VOCAB)

    input_ids = jax.random.randint(k_ids, (B, S), 0, VOCAB, dtype=jnp.int32)
    token_type_ids = jax.random.randint(k_tt, (B, S), 0, TYPE_VOCAB,
                                        dtype=jnp.int32)

    out = bert_embeddings(input_ids, token_type_ids, None, params,
                          eps=EPS, token_tile=128)
    jax.block_until_ready(out)

    # Reference check in plain JAX (module semantics, default position_ids).
    position_ids = jnp.broadcast_to(jnp.arange(S, dtype=jnp.int32)[None, :],
                                    (B, S))
    emb_ref = (params["word_embeddings"][input_ids]
               + params["position_embeddings"][position_ids]
               + params["token_type_embeddings"][token_type_ids])
    mu = emb_ref.mean(-1, keepdims=True)
    var = ((emb_ref - mu) ** 2).mean(-1, keepdims=True)
    ref = (emb_ref - mu) / jnp.sqrt(var + EPS)
    ref = ref * params["layer_norm_gamma"] + params["layer_norm_beta"]

    assert out.shape == (B, S, H)
    assert jnp.allclose(out, ref, atol=2e-5), "mismatch vs reference"

    print("KERNEL_OK")
</pallas_src>

<mosaic_0001>
module attributes {stable_mosaic.version = 11 : i64} {
  func.func @bert_embeddings_kernel(%arg0: i32, %arg1: i32, %arg2: memref<512xi32, #tpu.memory_space<smem>>, %arg3: memref<128x1xi32, #tpu.memory_space<vmem>>, %arg4: memref<512x128xf32, #tpu.memory_space<any>>, %arg5: memref<128x128xf32, #tpu.memory_space<vmem>>, %arg6: memref<2x128xf32, #tpu.memory_space<vmem>>, %arg7: memref<1x128xf32, #tpu.memory_space<vmem>>, %arg8: memref<1x128xf32, #tpu.memory_space<vmem>>, %arg9: memref<128x128xf32, #tpu.memory_space<vmem>>, %arg10: memref<128x128xf32, #tpu.memory_space<vmem>>, %arg11: memref<1x!tpu.dma_semaphore, #tpu.memory_space<semaphore_mem>>) attributes {dimension_semantics = [#tpu.dimension_semantics<parallel>, #tpu.dimension_semantics<parallel>], iteration_bounds = array<i64: 2, 2>, scalar_prefetch = 1 : i64, scratch_operands = 2 : i64, tpu.core_type = #tpu.core_type<tc>, window_params = [{transform_indices = @transform_0, window_bounds = array<i64: 128, 1>}, {}, {transform_indices = @transform_2, window_bounds = array<i64: 128, 128>}, {pipeline_mode = #tpu.pipeline_mode<synchronous>, transform_indices = @transform_3, window_bounds = array<i64: 2, 128>}, {pipeline_mode = #tpu.pipeline_mode<synchronous>, transform_indices = @transform_4, window_bounds = array<i64: 1, 128>}, {pipeline_mode = #tpu.pipeline_mode<synchronous>, transform_indices = @transform_5, window_bounds = array<i64: 1, 128>}, {transform_indices = @transform_6, window_bounds = array<i64: 128, 128>}]} {
    %c2_i32 = arith.constant 2 : i32
    %0 = arith.muli %arg0, %c2_i32 : i32
    %1 = arith.addi %0, %arg1 : i32
    %c128_i32 = arith.constant 128 : i32
    %2 = arith.muli %1, %c128_i32 : i32
    %c0_i32 = arith.constant 0 : i32
    %c128_i32_0 = arith.constant 128 : i32
    %3 = arith.addi %c0_i32, %c128_i32_0 : i32
    %c1_i32 = arith.constant 1 : i32
    scf.for %arg12 = %c0_i32 to %3 step %c1_i32  : i32 {
      %c1_i32_25 = arith.constant 1 : i32
      %50 = arith.muli %arg12, %c1_i32_25 : i32
      %c0_i32_26 = arith.constant 0 : i32
      %51 = arith.addi %c0_i32_26, %50 : i32
      %52 = arith.addi %2, %51 : i32
      %53 = arith.index_cast %52 : i32 to index
      %54 = memref.load %arg2[%53] : memref<512xi32, #tpu.memory_space<smem>>
      %c0_i32_27 = arith.constant 0 : i32
      %c0_i32_28 = arith.constant 0 : i32
      %55 = tpu.memref_slice %arg4[%54, %c0_i32_28] : memref<512x128xf32, #tpu.memory_space<any>> -> memref<1x128xf32, #tpu.memory_space<any>>
      %c0_i32_29 = arith.constant 0 : i32
      %56 = tpu.memref_slice %arg10[%51, %c0_i32_29] : memref<128x128xf32, #tpu.memory_space<vmem>> -> memref<1x128xf32, #tpu.memory_space<vmem>>
      %57 = tpu.memref_slice %arg11[%c0_i32_27] : memref<1x!tpu.dma_semaphore, #tpu.memory_space<semaphore_mem>> -> memref<1x!tpu.dma_semaphore, #tpu.memory_space<semaphore_mem>>
      %58 = tpu.memref_squeeze %57 : memref<1x!tpu.dma_semaphore, #tpu.memory_space<semaphore_mem>> -> memref<!tpu.dma_semaphore, #tpu.memory_space<semaphore_mem>>
      tpu.enqueue_dma source(%55 : memref<1x128xf32, #tpu.memory_space<any>>) target(%56 : memref<1x128xf32, #tpu.memory_space<vmem>>) target_semaphore(%58 : memref<!tpu.dma_semaphore, #tpu.memory_space<semaphore_mem>>)
    }
    %c128_i32_1 = arith.constant 128 : i32
    %c0 = arith.constant 0 : index
    %c0_2 = arith.constant 0 : index
    %4 = vector.load %arg5[%c0, %c0_2] : memref<128x128xf32, #tpu.memory_space<vmem>>, vector<128x128xf32>
    %c0_3 = arith.constant 0 : index
    %c0_4 = arith.constant 0 : index
    %5 = vector.load %arg3[%c0_3, %c0_4] : memref<128x1xi32, #tpu.memory_space<vmem>>, vector<128x1xi32>
    %c0_i32_5 = arith.constant 0 : i32
    %6 = vector.broadcast %c0_i32_5 : i32 to vector<128x1xi32>
    %7 = arith.cmpi eq, %5, %6 : vector<128x1xi32>
    %8 = arith.extui %7 : vector<128x1xi1> to vector<128x1xi32>
    %9 = arith.sitofp %8 : vector<128x1xi32> to vector<128x1xf32>
    %c0_6 = arith.constant 0 : index
    %c0_7 = arith.constant 0 : index
    %10 = vector.load %arg6[%c0_6, %c0_7] : memref<2x128xf32, #tpu.memory_space<vmem>>, vector<1x128xf32>
    %11 = vector.broadcast %9 : vector<128x1xf32> to vector<128x128xf32>
    %12 = vector.broadcast %10 : vector<1x128xf32> to vector<128x128xf32>
    %13 = arith.mulf %11, %12 : vector<128x128xf32>
    %14 = arith.addf %4, %13 : vector<128x128xf32>
    %c1_i32_8 = arith.constant 1 : i32
    %15 = vector.broadcast %c1_i32_8 : i32 to vector<128x1xi32>
    %16 = arith.cmpi eq, %5, %15 : vector<128x1xi32>
    %17 = arith.extui %16 : vector<128x1xi1> to vector<128x1xi32>
    %18 = arith.sitofp %17 : vector<128x1xi32> to vector<128x1xf32>
    %c1 = arith.constant 1 : index
    %c0_9 = arith.constant 0 : index
    %19 = vector.load %arg6[%c1, %c0_9] : memref<2x128xf32, #tpu.memory_space<vmem>>, vector<1x128xf32>
    %20 = vector.broadcast %18 : vector<128x1xf32> to vector<128x128xf32>
    %21 = vector.broadcast %19 : vector<1x128xf32> to vector<128x128xf32>
    %22 = arith.mulf %20, %21 : vector<128x128xf32>
    %23 = arith.addf %14, %22 : vector<128x128xf32>
    %c0_i32_10 = arith.constant 0 : i32
    %c128_i32_11 = arith.constant 128 : i32
    %24 = arith.addi %c0_i32_10, %c128_i32_11 : i32
    %c1_i32_12 = arith.constant 1 : i32
    scf.for %arg12 = %c0_i32_10 to %24 step %c1_i32_12  : i32 {
      %c0_i32_25 = arith.constant 0 : i32
      %c0_i32_26 = arith.constant 0 : i32
      %c0_i32_27 = arith.constant 0 : i32
      %50 = tpu.memref_slice %arg4[%c0_i32_26, %c0_i32_27] : memref<512x128xf32, #tpu.memory_space<any>> -> memref<1x128xf32, #tpu.memory_space<any>>
      %c0_i32_28 = arith.constant 0 : i32
      %c0_i32_29 = arith.constant 0 : i32
      %51 = tpu.memref_slice %arg10[%c0_i32_28, %c0_i32_29] : memref<128x128xf32, #tpu.memory_space<vmem>> -> memref<1x128xf32, #tpu.memory_space<vmem>>
      %52 = tpu.memref_slice %arg11[%c0_i32_25] : memref<1x!tpu.dma_semaphore, #tpu.memory_space<semaphore_mem>> -> memref<1x!tpu.dma_semaphore, #tpu.memory_space<semaphore_mem>>
      %53 = tpu.memref_squeeze %52 : memref<1x!tpu.dma_semaphore, #tpu.memory_space<semaphore_mem>> -> memref<!tpu.dma_semaphore, #tpu.memory_space<semaphore_mem>>
      tpu.wait_dma2 semaphore(%53 : memref<!tpu.dma_semaphore, #tpu.memory_space<semaphore_mem>>) src(%50 : memref<1x128xf32, #tpu.memory_space<any>>) dst(%51 : memref<1x128xf32, #tpu.memory_space<vmem>>)
    }
    %c0_13 = arith.constant 0 : index
    %c0_14 = arith.constant 0 : index
    %25 = vector.load %arg10[%c0_13, %c0_14] : memref<128x128xf32, #tpu.memory_space<vmem>>, vector<128x128xf32>
    %26 = arith.addf %23, %25 : vector<128x128xf32>
    %cst = arith.constant dense<0.000000e+00> : vector<128xf32>
    %27 = vector.multi_reduction <add>, %26, %cst [1] : vector<128x128xf32> to vector<128xf32>
    %28 = vector.shape_cast %27 : vector<128xf32> to vector<128x1xf32>
    %cst_15 = arith.constant 1.280000e+02 : f32
    %29 = vector.broadcast %cst_15 : f32 to vector<128x1xf32>
    %30 = arith.divf %28, %29 : vector<128x1xf32>
    %31 = vector.broadcast %30 : vector<128x1xf32> to vector<128x128xf32>
    %32 = arith.subf %26, %31 : vector<128x128xf32>
    %33 = arith.mulf %32, %32 : vector<128x128xf32>
    %cst_16 = arith.constant dense<0.000000e+00> : vector<128xf32>
    %34 = vector.multi_reduction <add>, %33, %cst_16 [1] : vector<128x128xf32> to vector<128xf32>
    %35 = vector.shape_cast %34 : vector<128xf32> to vector<128x1xf32>
    %cst_17 = arith.constant 1.280000e+02 : f32
    %36 = vector.broadcast %cst_17 : f32 to vector<128x1xf32>
    %37 = arith.divf %35, %36 : vector<128x1xf32>
    %cst_18 = arith.constant 9.99999996E-13 : f32
    %38 = vector.broadcast %cst_18 : f32 to vector<128x1xf32>
    %39 = arith.addf %37, %38 : vector<128x1xf32>
    %40 = math.rsqrt %39 : vector<128x1xf32>
    %41 = vector.broadcast %40 : vector<128x1xf32> to vector<128x128xf32>
    %42 = arith.mulf %32, %41 : vector<128x128xf32>
    %c0_19 = arith.constant 0 : index
    %c0_20 = arith.constant 0 : index
    %43 = vector.load %arg7[%c0_19, %c0_20] : memref<1x128xf32, #tpu.memory_space<vmem>>, vector<1x128xf32>
    %44 = vector.broadcast %43 : vector<1x128xf32> to vector<128x128xf32>
    %45 = arith.mulf %42, %44 : vector<128x128xf32>
    %c0_21 = arith.constant 0 : index
    %c0_22 = arith.constant 0 : index
    %46 = vector.load %arg8[%c0_21, %c0_22] : memref<1x128xf32, #tpu.memory_space<vmem>>, vector<1x128xf32>
    %47 = vector.broadcast %46 : vector<1x128xf32> to vector<128x128xf32>
    %48 = arith.addf %45, %47 : vector<128x128xf32>
    %c0_23 = arith.constant 0 : index
    %c0_24 = arith.constant 0 : index
    %49 = vector.load %arg9[%c0_23, %c0_24] : memref<128x128xf32, #tpu.memory_space<vmem>>, vector<128x128xf32>
    tpu.vector_store %arg9[%c0_23, %c0_24], %48 {strides = array<i32>} : memref<128x128xf32, #tpu.memory_space<vmem>>, vector<128x128xf32>,
    return
  }
  func.func @transform_0(%arg0: i32, %arg1: i32, %arg2: memref<512xi32, #tpu.memory_space<smem>>) -> (i32, i32) {
    %c2_i32 = arith.constant 2 : i32
    %0 = arith.muli %arg0, %c2_i32 : i32
    %1 = arith.addi %0, %arg1 : i32
    %c0_i32 = arith.constant 0 : i32
    %c0_i32_0 = arith.constant 0 : i32
    return %1, %c0_i32 : i32, i32
  }
  func.func @transform_2(%arg0: i32, %arg1: i32, %arg2: memref<512xi32, #tpu.memory_space<smem>>) -> (i32, i32) {
    %c0_i32 = arith.constant 0 : i32
    %c0_i32_0 = arith.constant 0 : i32
    return %arg1, %c0_i32 : i32, i32
  }
  func.func @transform_3(%arg0: i32, %arg1: i32, %arg2: memref<512xi32, #tpu.memory_space<smem>>) -> (i32, i32) {
    %c0_i32 = arith.constant 0 : i32
    %c0_i32_0 = arith.constant 0 : i32
    %c0_i32_1 = arith.constant 0 : i32
    return %c0_i32, %c0_i32_0 : i32, i32
  }
  func.func @transform_4(%arg0: i32, %arg1: i32, %arg2: memref<512xi32, #tpu.memory_space<smem>>) -> (i32, i32) {
    %c0_i32 = arith.constant 0 : i32
    %c0_i32_0 = arith.constant 0 : i32
    %c0_i32_1 = arith.constant 0 : i32
    return %c0_i32, %c0_i32_0 : i32, i32
  }
  func.func @transform_5(%arg0: i32, %arg1: i32, %arg2: memref<512xi32, #tpu.memory_space<smem>>) -> (i32, i32) {
    %c0_i32 = arith.constant 0 : i32
    %c0_i32_0 = arith.constant 0 : i32
    %c0_i32_1 = arith.constant 0 : i32
    return %c0_i32, %c0_i32_0 : i32, i32
  }
  func.func @transform_6(%arg0: i32, %arg1: i32, %arg2: memref<512xi32, #tpu.memory_space<smem>>) -> (i32, i32) {
    %c2_i32 = arith.constant 2 : i32
    %0 = arith.muli %arg0, %c2_i32 : i32
    %1 = arith.addi %0, %arg1 : i32
    %c0_i32 = arith.constant 0 : i32
    %c0_i32_0 = arith.constant 0 : i32
    return %1, %c0_i32 : i32, i32
  }
}

</mosaic_0001>

<bundles_post_ra>
// kernel: tpu_custom_call.1
= control target key start
LH: loop header
LB: loop body
LE: loop exit
PB: predicated region body
PF: predicated region fallthrough
CT: control target
= control target key end

     0   :  { %s2293_s0 = inlined_call_operand.vmem [shape: s32[512], index: 0, kind: input, shape index: {}]   ;;  %s2294_s1 = inlined_call_operand.vmem [shape: s32[512,1], index: 1, kind: input, shape index: {}]   ;;  %s2295_s2 = inlined_call_operand.vmem [shape: f32[512,128], index: 2, kind: input, shape index: {}]   ;;  %s2296_s3 = inlined_call_operand.hbm [shape: f32[256,128], index: 3, kind: input, shape index: {}]   ;;  %s2297_s4 = inlined_call_operand.vmem [shape: f32[2,128], index: 4, kind: input, shape index: {}]   ;;  %s2298_s5 = inlined_call_operand.vmem [shape: f32[1,128], index: 5, kind: input, shape index: {}]   ;;  %s2299_s6 = inlined_call_operand.vmem [shape: f32[1,128], index: 6, kind: input, shape index: {}]   ;;  %s2300_s7 = inlined_call_operand.hbm [shape: f32[512,128], index: 7, kind: output, shape index: {}]  }
   0x1   :  { %2308 = sst [smem:[#allocation21_spill]] %s2296_s3  ;;  %s12_s26 = sshll.u32 %s2293_s0, 4  ;;  %s13_s26 = int_to_ptr.vmem [resolvable:$true] %s12_s26 }
   0x2   :  { %s1451_s27 = scalar_lea.vmem %s13_s26, 64  ;;  %p1456_p1 = scmp.lt.s32.totalorder %s13_s26, %s13_s26 }
   0x3   :  { %p1452_p0 = scmp.ne.s32.totalorder %s13_s26, %s1451_s27  ;;  %p1457_p2 = scmp.lt.s32.totalorder %s1451_s27, %s1451_s27 }
   0x5   :  { %p1458_p3 = por %p1457_p2, %p1456_p1 }
   0x7   :  { %p1459_p4 = pnand %p1458_p3, %p1452_p0 }
   0x9   :  { %1462 = shalt.err (!%p1459_p4)  }
   0xa   :  { %s1637_s28 = smov [#allocation5]  }
   0xb   :  { %15 = dma.vmem_to_smem %s13_s26, 64, %s1637_s28, [#allocation4] }
   0xc   :  { %1573 = dma.done.wait [#allocation4], 64 }
   0xd   :  { %1574 = vsyncadd [#allocation4], 4294967232 }
   0xe   :  { %17 = sfence }
   0xf   :  { %18 = vsyncpa [#allocation7], 0 }
  0x10   :  { %20 = vsyncpa [#allocation7 + $0x1], 0 }
  0x11   :  { %21 = vsyncpa [#allocation8], 0 }
  0x12   :  { %23 = vsyncpa [#allocation8 + $0x1], 0  ;;  %s1689_s29 = smov 0   ;;  %s1691_s0 = smov 0  }
  0x13   :  { %s1693_s30 = smov 0   ;;  %s1695_s8 = smov 0  }
  0x14   :  { %s1697_s9 = smov 0   ;;  %s1699_s10 = smov 0  }
  0x15   :  { %s1701_s11 = smov 0   ;;  %s1703_s12 = smov 0  }
  0x16   :  { %s1705_s13 = smov 0   ;;  %s1707_s14 = smov 0  }
  0x17   :  { %s1709_s15 = smov 0  }
  0x18 LB: > { %2309 = sst [smem:[#allocation15_spill]] %s1607_s10  ;;  %s1148_s16 = sadd.s32 4294967295, %s1627_s15   ;;  %s1627_s15 = sphi %s1709_s15, %s29_s15   ;;  %s1623_s14 = sphi %s1707_s14, %s2329_s14   ;;  %s1619_s13 = sphi %s1705_s13, %s2328_s13   ;;  %s1615_s12 = sphi %s1703_s12, %s2327_s12   ;;  %s1611_s11 = sphi %s1701_s11, %s2326_s11   ;;  %s1607_s10 = sphi %s1699_s10, %s2325_s10   ;;  %s1603_s9 = sphi %s1697_s9, %s2334_s9   ;;  %s1599_s8 = sphi %s1695_s8, %s2333_s8   ;;  %s1595_s30 = sphi %s1693_s30, %s2332_s30   ;;  %s1591_s0 = sphi %s1691_s0, %s2331_s0   ;;  %s1587_s29 = sphi %s1689_s29, %s2330_s29  }
  0x19   : > { %2310 = sst [smem:[#allocation16_spill]] %s1619_s13  ;;  %s1149_s17 = sadd.s32 4294967294, %s1627_s15  }
  0x1a   : > { %2311 = sst [smem:[#allocation17_spill]] %s1623_s14  ;;  %s38_s18 = sadd.s32 1, %s1619_s13 }
  0x1b   : > { %s41_s19 = sadd.s32 1, %s1623_s14  ;;  %p39_p5 = scmp.ge.s32.totalorder %s38_s18, 2 }
  0x1c   : > { %s78_s20 = sadd.s32 1, %s1607_s10  ;;  %p85_p6 = scmp.ne.s32.totalorder %s1607_s10, %s1603_s9 }
  0x1d   : > { %p86_p7 = scmp.eq.s32.totalorder %s1627_s15, 0  ;;  %s2336_s18 = smov (%p39_p5, %s38_s18), 0 }
  0x1e   : > { %2312 = sst [smem:[#allocation18_spill]] %s2336_s18  ;;  %s2338_s19 = smov (!%p39_p5, %s41_s19), %s1623_s14 }
  0x1f   : > { %s75_s21 = ssub.s32 %s1619_s13, %s2336_s18  ;;  %p1755_p8 = por %p86_p7, %p85_p6 }
  0x20   : > { %p43_p9 = scmp.ge.s32.totalorder %s2338_s19, 2  ;;  %p76_p10 = scmp.eq.s32.totalorder %s75_s21, 0 }
  0x21   : > { %p91_p11 = scmp.ne.s32.totalorder %s1603_s9, %s1599_s8  ;;  %p92_p12 = scmp.eq.s32.totalorder %s1148_s16, 0 }
  0x22   : > { %s2340_s19 = smov (%p43_p9, %s2338_s19), 0  ;;  %s1152_s25 = sshll.u32 %s1623_s14, 1 }
  0x23   : > { %2314 = sst [smem:[#allocation19_spill]] %s2340_s19  ;;  %p1765_p13 = por %p92_p12, %p91_p11 }
  0x24   : > { %s1763_s23 = scalar_select %p76_p10, %s1607_s10, %s78_s20  }
  0x25   : > { %s165_s26 = sadd.s32 %s1619_s13, %s1152_s25  ;;  %s1153_s27 = sshll.u32 %s2340_s19, 1 }
  0x26   : > { %2315 = sst [smem:[#allocation20_spill]] %s1763_s23  ;;  %s167_s28 = sadd.s32 %s1153_s27, %s2336_s18 }
  0x27   : > { %s171_s21 = sadd.s32 1, %s1595_s30  ;;  %s168_s8 = ssub.s32 %s165_s26, %s167_s28 }
  0x28   : > { %p181_p0 = scmp.ne.s32.totalorder %s1595_s30, %s1591_s0  ;;  %p169_p1 = scmp.eq.s32.totalorder %s168_s8, 0 }
  0x29   : > { %p182_p2 = scmp.eq.s32.totalorder %s1148_s16, 3  ;;  %p187_p3 = scmp.ne.s32.totalorder %s1591_s0, %s1587_s29 }
  0x2a   : > { %p188_p4 = scmp.eq.s32.totalorder %s1149_s17, 3  ;;  %p1224_p7 = scmp.lt.s32.totalorder %s1627_s15, 4 }
  0x2b   : > { %s1779_s20 = scalar_select %p169_p1, %s1595_s30, %s171_s21  }
  0x2c   : > { %p1781_p5 = por %p182_p2, %p181_p0  ;;  %p1785_p6 = por %p188_p4, %p187_p3 }
  0x2d   : > { %s230_s25 = sand.u32 1, %s1607_s10   ;;  %s1210_s27 = sshll.u32 %s1619_s13, 11 }
  0x2e   : > { %s2317_s23 = scalar_select %p1781_p5, 1, 0 }
  0x2f   : > { %s2318_s14 = scalar_select %p1785_p6, 1, 0 }
  0x30   : > { %s1156_s26 = sshll.u32 %s230_s25, 7  ;;  %s2319_s3 = sld [smem:[#allocation21_spill]] }
  0x31   : > { %s234_s17 = scalar_lea.vmem [#allocation6], %s1156_s26  ;;  %p1799_p9 = pnand %p1224_p7, %p1755_p8 }
  0x32   : > { %s241_s21 = sshll.u32 %s234_s17, 4  ;;  %s1805_s18 = scalar_lea.sflag [#allocation7], %s230_s25  ;;  %s1803_s21 = int_to_ptr.vmem [resolvable:$true] %s241_s21 }
  0x33   : > { %p1465_p11 = pneg %p1799_p9 }
  0x36   : > { %s1795_s16 = scalar_lea.hbm %s2319_s3, %s1210_s27  ;;  %s1468_s26 = scalar_lea.hbm %s2319_s3, 4096 }
  0x37   : > { %s1463_s19 = scalar_lea.hbm %s1795_s16, 2048  ;;  %p1469_p8 = scmp.lt.u32.totalorder %s1795_s16, %s2319_s3 }
  0x38   : > { %p1464_p10 = scmp.ne.s32.totalorder %s1795_s16, %s1463_s19  ;;  %p1470_p1 = scmp.lt.u32.totalorder %s1468_s26, %s1463_s19 }
  0x39   : > { %p1472_p3 = scmp.lt.u32.totalorder %s1463_s19, %s1795_s16 }
  0x3a   : > { %p1466_p12 = pnand %p1465_p11, %p1464_p10  ;;  %p1471_p2 = por %p1470_p1, %p1469_p8 }
  0x3c   : > { %p1467_p0 = pneg %p1466_p12  ;;  %p1473_p4 = por %p1472_p3, %p1471_p2 }
  0x3e   : > { %p1474_p7 = pnand %p1473_p4, %p1467_p0 }
  0x40   : > { %1477 = shalt.err (!%p1474_p7)
}
  0x41   : > { %s1478_s25 = scalar_lea.vmem %s1803_s21, 2048  ;;  %s1638_s27 = smov [#allocation6]  }
  0x42   : > { %p1479_p10 = scmp.ne.s32.totalorder %s1803_s21, %s1478_s25  ;;  %s1483_s22 = sshll.u32 %s1638_s27, 4  ;;  %s1484_s22 = int_to_ptr.vmem [resolvable:$false] %s1483_s22 }
  0x43   : > { %s1485_s28 = scalar_lea.vmem %s1484_s22, 4096  ;;  %p1486_p5 = scmp.lt.s32.totalorder %s1803_s21, %s1484_s22 }
  0x44   : > { %p1481_p12 = pnand %p1479_p10, %p1465_p11  ;;  %p1487_p8 = scmp.lt.s32.totalorder %s1485_s28, %s1478_s25 }
  0x46   : > { %p1482_p6 = pneg %p1481_p12  ;;  %p1488_p1 = por %p1487_p8, %p1486_p5 }
  0x48   : > { %p1489_p2 = pnand %p1488_p1, %p1482_p6 }
  0x4a   : > { %1492 = shalt.err (!%p1489_p2)
}
  0x4b   : > { %s1639_s19 = smov 128   ;;  %s1640_s26 = smov 8  }
  0x4c   : > { %1219 = dma.hbm_to_vmem [thread:$0]  (!%p1799_p9), %s1795_s16, 2048, %s1803_s21, %s1805_s18, %s1639_s19, %s1639_s19, %s1640_s26  }
  0x4d   : > { %p1159_p11 = scmp.ge.s32.totalorder %s1627_s15, 1  ;;  %p249_p0 = scmp.lt.s32.totalorder %s1627_s15, 5 }
  0x4f   : > { %p250_p3 = pnand %p1159_p11, %p249_p0 }
  0x50   : > { %s255_s17 = sand.u32 (!%p250_p3), 1, %s1603_s9  }
  0x51   : > { %253 = sbr.rel (%p250_p3) target bundleno = 640 (0x280), region = 40  ;;  %s1160_s25 = sshll.u32 (!%p250_p3), %s255_s17, 7 }
  0x52   : > { %s256_s27 = scalar_lea.sflag (!%p250_p3), [#allocation7], %s255_s17  ;;  %s1836_s22 = scalar_lea.vmem (!%p250_p3), [#allocation6], %s1160_s25 }
  0x58   : > { %1576 = dma.done.wait (%p1765_p13), %s256_s27, 2048  }
  0x59   : > { %1578 = vsyncadd (%p1765_p13), %s256_s27, 4294965248  ;;  %s2305_s18 = sand.u32 1, %s1591_s0   ;;  %s1162_s16 = sshll.u32 %s1615_s12, 1 }
  0x5a   : > { %s1161_s21 = sshll.u32 %s2305_s18, 7  ;;  %s1847_s8 = sadd.s32 %s1611_s11, %s1162_s16 }
  0x5b   : > { %s1163_s28 = sshll.u32 %s1847_s8, 4  ;;  %s1166_s19 = sshll.u32 %s1847_s8, 7 }
  0x5c   : > { %p296_p5 = scmp.lt.s32.totalorder %s1163_s28, 63  ;;  %s1856_s27 = scalar_lea.vmem [#allocation9], %s1161_s21 }
  0x5d   : > { %s1629_s3 = smov 0  }
  0x5e   : > { %s2342_s28 = smov (!%p296_p5, %s1163_s28), 63 }
  0x5f   : > { %s1164_s26 = sshll.u32 %s2342_s28, 3 }
  0x60   : > { %s1854_s25 = scalar_lea.vmem %s2294_s1, %s1164_s26 }
  0x61 LB: >> { %s316_s11 = sadd.s32 %s1631_s3, %s1166_s19  ;;  %s319_s10 = scalar_lea.vmem [#allocation2], %s1631_s3  ;;  %s1631_s3 = sphi %s1629_s3, %s315_s3  }
  0x62   : >> { %s317_s12 = sld [smem:[#allocation5 + %s316_s11]] }
  0x68   : >> { %s318_s13 = scalar_lea.vmem %s2295_s2, %s317_s12 }
  0x69   : >> { %v337_v0 = vld [vmem:[%s318_s13] sm:$0x1] }
  0x6a   : >> { %338 = vst [vmem:[%s319_s10] sm:$0x1] %v337_v0 }
  0x6b   : >> { %363 = vsyncadd [#allocation3], 16  ;;  %s315_s3 = sadd.s32 1, %s1631_s3  }
  0x6c   : >> { %p312_p13 = scmp.ge.s32.totalorder %s315_s3, 128  }
  0x6d   : > { %v1862_v1 = vld [vmem:[%s1854_s25 + $0x20] sm:$0xff] (%p312_p13)  ;;  %v1865_v2 = vld [vmem:[%s1854_s25 + $0x28] sm:$0xff] (%p312_p13)  ;;  %v1641_v4 = vmov (%p312_p13), 0   ;;  %v1876_v6 = vld [vmem:[%s1854_s25 + $0x30] sm:$0xff] (%p312_p13)  ;;  %v1642_v7 = vmov (%p312_p13), 0.0  }
  0x6e   : > { %314 = sbr.rel (!%p312_p13) target bundleno = 97 (0x61), region = 144  ;;  %v1868_v3 = vld [vmem:[%s1854_s25] sm:$0xff] (%p312_p13)  ;;  %1348 = vset.pattern.permute.xlu1 (%p312_p13), %v1641_v4  ;;  %1337 = vset.pattern.permute.xlu0 (%p312_p13), %v1641_v4  ;;  %vm400_vm0 = vcmp.eq.s32.totalorder (%p312_p13), %v1862_v1, 0  ;;  %vm401_vm1 = vcmp.eq.s32.totalorder (%p312_p13), %v1865_v2, 0  ;;  %v1873_v5 = vld [vmem:[%s1854_s25 + $0x8] sm:$0xff] (%p312_p13)  ;;  %v1883_v10 = vld [vmem:[%s1854_s25 + $0x38] sm:$0xff] (%p312_p13) }
  0x6f   : > { %v1171_v8 = vsel (%p312_p13), %vm400_vm0, 1.0, %v1642_v7  ;;  %v1172_v9 = vsel (%p312_p13), %vm401_vm1, 1.0, %v1642_v7  ;;  %vm396_vm2 = vcmp.eq.s32.totalorder (%p312_p13), %v1868_v3, 0  ;;  %vm397_vm3 = vcmp.eq.s32.totalorder (%p312_p13), %v1873_v5, 0  ;;  %v382_v11 = vld [vmem:[%s1854_s25 + $0x10] sm:$0xff] (%p312_p13)  ;;  %v383_v15 = vld [vmem:[%s1854_s25 + $0x18] sm:$0xff] (%p312_p13) }
  0x70   : > { %v1349_v12 = vpack.i.bf16 (%p312_p13), %v1172_v9, %v1171_v8  ;;  %v1167_v13 = vsel (%p312_p13), %vm396_vm2, 1.0, %v1642_v7  ;;  %v1168_v14 = vsel (%p312_p13), %vm397_vm3, 1.0, %v1642_v7  ;;  %v1890_v16 = vld [vmem:[%s1854_s25 + $0x50] sm:$0xff] (%p312_p13)  ;;  %vm402_vm4 = vcmp.eq.s32.totalorder (%p312_p13), %v1876_v6, 0  ;;  %v1895_v18 = vld [vmem:[%s1854_s25 + $0x58] sm:$0xff] (%p312_p13)  ;;  %v1898_v19 = vld [vmem:[%s1854_s25 + $0x40] sm:$0xff] (%p312_p13) }
  0x71   : > { %v1338_v17 = vpack.i.bf16 (%p312_p13), %v1168_v14, %v1167_v13  ;;  %vm403_vm5 = vcmp.eq.s32.totalorder (%p312_p13), %v1883_v10, 0  ;;  %v1173_v20 = vsel (%p312_p13), %vm402_vm4, 1.0, %v1642_v7  ;;  %vm398_vm6 = vcmp.eq.s32.totalorder (%p312_p13), %v382_v11, 0  ;;  %v1903_v22 = vld [vmem:[%s1854_s25 + $0x48] sm:$0xff] (%p312_p13)  ;;  %v1906_v23 = vld [vmem:[%s1854_s25 + $0x70] sm:$0xff] (%p312_p13)  ;;  %v1912_v27 = vld [vmem:[%s1854_s25 + $0x78] sm:$0xff] (%p312_p13) }
  0x72   : > { %1350 = vperm.xlu1 (%p312_p13), %1348, %v1349_v12   ;;  %v1174_v21 = vsel (%p312_p13), %vm403_vm5, 1.0, %v1642_v7  ;;  %vm399_vm7 = vcmp.eq.s32.totalorder (%p312_p13), %v383_v15, 0  ;;  %v1169_v25 = vsel (%p312_p13), %vm398_vm6, 1.0, %v1642_v7  ;;  %vm406_vm8 = vcmp.eq.s32.totalorder (%p312_p13), %v1890_v16, 0  ;;  %v1918_v30 = vld [vmem:[%s1854_s25 + $0x60] sm:$0xff] (%p312_p13)  ;;  %v1921_v31 = vld [vmem:[%s1854_s25 + $0x68] sm:$0xff] (%p312_p13) }
  0x73   : > { %1339 = vperm.xlu0 (%p312_p13), %1337, %v1338_v17   ;;  %v1354_v24 = vpack.i.bf16 (%p312_p13), %v1174_v21, %v1173_v20  ;;  %v1170_v26 = vsel (%p312_p13), %vm399_vm7, 1.0, %v1642_v7  ;;  %vm407_vm9 = vcmp.eq.s32.totalorder (%p312_p13), %v1895_v18, 0  ;;  %v1177_v29 = vsel (%p312_p13), %vm406_vm8, 1.0, %v1642_v7 }
  0x74   : > { %v1343_v28 = vpack.i.bf16 (%p312_p13), %v1170_v26, %v1169_v25  ;;  %vm404_vm10 = vcmp.eq.s32.totalorder (%p312_p13), %v1898_v19, 0  ;;  %v1178_v32 = vsel (%p312_p13), %vm407_vm9, 1.0, %v1642_v7  ;;  %vm405_vm11 = vcmp.eq.s32.totalorder (%p312_p13), %v1903_v22, 0  ;;  %v364_v25 = vld [vmem:[%s1836_s22] sm:$0xff] (%p312_p13) }
  0x75   : > { %v1175_v33 = vsel %vm404_vm10, 1.0, %v1642_v7  ;;  %vm410_vm12 = vcmp.eq.s32.totalorder %v1906_v23, 0  ;;  %v1364_v34 = vpack.i.bf16 %v1178_v32, %v1177_v29  ;;  %v1176_v35 = vsel %vm405_vm11, 1.0, %v1642_v7  ;;  %v371_v32 = vld [vmem:[%s1836_s22 + $0x38] sm:$0xff] }
  0x76   : > { %1355 = vperm.xlu1 %1348, %v1354_v24   ;;  %vm411_vm13 = vcmp.eq.s32.totalorder %v1912_v27, 0  ;;  %v1181_v36 = vsel %vm410_vm12, 1.0, %v1642_v7  ;;  %v1359_v37 = vpack.i.bf16 %v1176_v35, %v1175_v33  ;;  %vm408_vm14 = vcmp.eq.s32.totalorder %v1918_v30, 0 }
  0x77   : > { %1344 = vperm.xlu0 %1337, %v1343_v28   ;;  %v1182_v38 = vsel %vm411_vm13, 1.0, %v1642_v7  ;;  %vm409_vm15 = vcmp.eq.s32.totalorder %v1921_v31, 0  ;;  %v1179_v39 = vsel %vm408_vm14, 1.0, %v1642_v7  ;;  %vm563_vm0 = vcmp.eq.s32.totalorder %v382_v11, 1 }
  0x78   : > { %v1180_v40 = vsel %vm409_vm15, 1.0, %v1642_v7  ;;  %vm561_vm1 = vcmp.eq.s32.totalorder %v1868_v3, 1  ;;  %vm562_vm2 = vcmp.eq.s32.totalorder %v1873_v5, 1  ;;  %vm564_vm3 = vcmp.eq.s32.totalorder %v383_v15, 1 }
  0x79   : > { %v1374_v41 = vpack.i.bf16 %v1182_v38, %v1181_v36  ;;  %v1369_v42 = vpack.i.bf16 %v1180_v40, %v1179_v39  ;;  %v1186_v43 = vsel %vm563_vm0, 1.0, %v1642_v7  ;;  %v1187_v44 = vsel %vm564_vm3, 1.0, %v1642_v7  ;;  %v366_v36 = vld [vmem:[%s1836_s22 + $0x10] sm:$0xff] }
  0x7a   : > { %1365 = vperm.xlu1 %1348, %v1364_v34   ;;  %v1184_v45 = vsel %vm561_vm1, 1.0, %v1642_v7  ;;  %v1185_v46 = vsel %vm562_vm2, 1.0, %v1642_v7  ;;  %vm567_vm4 = vcmp.eq.s32.totalorder %v1876_v6, 1  ;;  %vm568_vm5 = vcmp.eq.s32.totalorder %v1883_v10, 1  ;;  %v1968_v10 = vld [vmem:[%s2297_s4] ss:$0 sm:$0xff] }
  0x7b   : > { %1360 = vperm.xlu0 %1337, %v1359_v37   ;;  %vm565_vm6 = vcmp.eq.s32.totalorder %v1862_v1, 1  ;;  %vm566_vm7 = vcmp.eq.s32.totalorder %v1865_v2, 1  ;;  %v1384_v47 = vpack.i.bf16 %v1187_v44, %v1186_v43  ;;  %v1379_v48 = vpack.i.bf16 %v1185_v46, %v1184_v45  ;;  %v367_v37 = vld [vmem:[%s1836_s22 + $0x18] sm:$0xff] }
  0x7c   : > { %v1190_v49 = vsel %vm567_vm4, 1.0, %v1642_v7  ;;  %v1191_v50 = vsel %vm568_vm5, 1.0, %v1642_v7  ;;  %v1188_v51 = vsel %vm565_vm6, 1.0, %v1642_v7  ;;  %v1189_v52 = vsel %vm566_vm7, 1.0, %v1642_v7 }
  0x7d   : > { %vm571_vm8 = vcmp.eq.s32.totalorder %v1890_v16, 1  ;;  %vm572_vm9 = vcmp.eq.s32.totalorder %v1895_v18, 1  ;;  %vm569_vm10 = vcmp.eq.s32.totalorder %v1898_v19, 1  ;;  %vm570_vm11 = vcmp.eq.s32.totalorder %v1903_v22, 1  ;;  %v368_v22 = vld [vmem:[%s1836_s22 + $0x20] sm:$0xff] }
  0x7e   : > { %1375 = vperm.xlu1 %1348, %v1374_v41   ;;  %v1394_v53 = vpack.i.bf16 %v1191_v50, %v1190_v49  ;;  %v1389_v54 = vpack.i.bf16 %v1189_v52, %v1188_v51  ;;  %v1194_v55 = vsel %vm571_vm8, 1.0, %v1642_v7  ;;  %v1195_v56 = vsel %vm572_vm9, 1.0, %v1642_v7  ;;  %v375_v49 = vld [vmem:[%s1836_s22 + $0x58] sm:$0xff]  ;;  %v1997_v50 = vld [vmem:[%s2297_s4 + $0x1] ss:$0 sm:$0xff] }
  0x7f   : > { %1370 = vperm.xlu0 %1337, %v1369_v42   ;;  %v1192_v57 = vsel %vm569_vm10, 1.0, %v1642_v7  ;;  %v1193_v58 = vsel %vm570_vm11, 1.0, %v1642_v7  ;;  %vm575_vm12 = vcmp.eq.s32.totalorder %v1906_v23, 1  ;;  %vm576_vm13 = vcmp.eq.s32.totalorder %v1912_v27, 1  ;;  %v369_v23 = vld [vmem:[%s1836_s22 + $0x28] sm:$0xff] }
  0x80   : > { %vm573_vm14 = vcmp.eq.s32.totalorder %v1918_v30, 1  ;;  %vm574_vm15 = vcmp.eq.s32.totalorder %v1921_v31, 1  ;;  %v1404_v59 = vpack.i.bf16 %v1195_v56, %v1194_v55  ;;  %v1399_v60 = vpack.i.bf16 %v1193_v58, %v1192_v57  ;;  %v365_v30 = vld [vmem:[%s1836_s22 + $0x8] sm:$0xff]  ;;  %v370_v31 = vld [vmem:[%s1836_s22 + $0x30] sm:$0xff] }
  0x81   : > { %v1198_v61 = vsel %vm575_vm12, 1.0, %v1642_v7  ;;  %v1199_v62 = vsel %vm576_vm13, 1.0, %v1642_v7  ;;  %v1196_v63 = vsel %vm573_vm14, 1.0, %v1642_v7  ;;  %v1197_v0 = vsel %vm574_vm15, 1.0, %v1642_v7 }
  0x82   : > { %1385 = vperm.xlu1 %1348, %v1384_v47   ;;  %v1414_v1 = vpack.i.bf16 %v1199_v62, %v1198_v61  ;;  %v1409_v2 = vpack.i.bf16 %v1197_v0, %v1196_v63 }
  0x83   : > { %1380 = vperm.xlu0 %1337, %v1379_v48   ;;  %v374_v48 = vld [vmem:[%s1836_s22 + $0x50] sm:$0xff] }
  0x86   : > { %1395 = vperm.xlu1 %1348, %v1394_v53  }
  0x87   : > { %1390 = vperm.xlu0 %1337, %v1389_v54  }
  0x8a   : > { %1405 = vperm.xlu1 %1348, %v1404_v59  }
  0x8b   : > { %1400 = vperm.xlu0 %1337, %v1399_v60  }
  0x8e   : > { %1415 = vperm.xlu1 %1348, %v1414_v1   ;;  %v372_v1 = vld [vmem:[%s1836_s22 + $0x40] sm:$0xff] }
  0x8f   : > { %1410 = vperm.xlu0 %1337, %v1409_v2   ;;  %v373_v2 = vld [vmem:[%s1836_s22 + $0x48] sm:$0xff] }
  0xf1   : > { %v1351_v3 = vpop.permute.xlu1 %1350 }
  0xf2   : > { %v1340_v4 = vpop.permute.xlu0 %1339  ;;  %v1353_v8 = vunpack.i.h.bf16 %v1351_v3  ;;  %v1352_v9 = vunpack.i.l.bf16 %v1351_v3 }
  0xf3   : > { %v1342_v7 = vunpack.i.h.bf16 %v1340_v4  ;;  %v1341_v11 = vunpack.i.l.bf16 %v1340_v4 }
  0xf4   : > { %v534_v18 = vmul.f32 %v1353_v8, %v1968_v10  ;;  %v533_v19 = vmul.f32 %v1352_v9, %v1968_v10 }
  0xf5   : > { %v1356_v5 = vpop.permute.xlu1 %1355  ;;  %v530_v24 = vmul.f32 %v1342_v7, %v1968_v10  ;;  %v529_v26 = vmul.f32 %v1341_v11, %v1968_v10 }
  0xf6   : > { %v1345_v6 = vpop.permute.xlu0 %1344  ;;  %v1358_v12 = vunpack.i.h.bf16 %v1356_v5  ;;  %v1357_v13 = vunpack.i.l.bf16 %v1356_v5  ;;  %v549_v40 = vadd.f32 %v533_v19, %v368_v22  ;;  %v550_v41 = vadd.f32 %v534_v18, %v369_v23 }
  0xf7   : > { %v1347_v15 = vunpack.i.h.bf16 %v1345_v6  ;;  %v1346_v16 = vunpack.i.l.bf16 %v1345_v6  ;;  %v545_v44 = vadd.f32 %v529_v26, %v364_v25  ;;  %v546_v45 = vadd.f32 %v530_v24, %v365_v30 }
  0xf8   : > { %v536_v27 = vmul.f32 %v1358_v12, %v1968_v10  ;;  %v535_v28 = vmul.f32 %v1357_v13, %v1968_v10 }
  0xf9   : > { %v1366_v14 = vpop.permute.xlu1 %1365  ;;  %v532_v33 = vmul.f32 %v1347_v15, %v1968_v10  ;;  %v531_v34 = vmul.f32 %v1346_v16, %v1968_v10 }
  0xfa   : > { %v1361_v17 = vpop.permute.xlu0 %1360  ;;  %v1368_v20 = vunpack.i.h.bf16 %v1366_v14  ;;  %v1367_v21 = vunpack.i.l.bf16 %v1366_v14  ;;  %v551_v46 = vadd.f32 %v535_v28, %v370_v31  ;;  %v552_v47 = vadd.f32 %v536_v27, %v371_v32 }
  0xfb   : > { %v1363_v38 = vunpack.i.h.bf16 %v1361_v17  ;;  %v1362_v39 = vunpack.i.l.bf16 %v1361_v17  ;;  %v547_v52 = vadd.f32 %v531_v34, %v366_v36  ;;  %v548_v53 = vadd.f32 %v532_v33, %v367_v37 }
  0xfc   : > { %v540_v42 = vmul.f32 %v1368_v20, %v1968_v10  ;;  %v539_v43 = vmul.f32 %v1367_v21, %v1968_v10 }
  0xfd   : > { %v1979_v29 = vpop.permute.xlu1 %1375  ;;  %v538_v57 = vmul.f32 %v1363_v38, %v1968_v10  ;;  %v537_v58 = vmul.f32 %v1362_v39, %v1968_v10 }
  0xfe   : > { %v1986_v35 = vpop.permute.xlu0 %1370  ;;  %v555_v61 = vadd.f32 %v539_v43, %v374_v48  ;;  %v556_v62 = vadd.f32 %v540_v42, %v375_v49  ;;  %v1378_v3 = vunpack.i.h.bf16 %v1979_v29  ;;  %v1377_v4 = vunpack.i.l.bf16 %v1979_v29  ;;  %v378_v42 = vld [vmem:[%s1836_s22 + $0x70] sm:$0xff]  ;;  %v379_v43 = vld [vmem:[%s1836_s22 + $0x78] sm:$0xff]  ;;  %v377_v48 = vld [vmem:[%s1836_s22 + $0x68] sm:$0xff] }
  0xff   : > { %v553_v18 = vadd.f32 %v537_v58, %v372_v1  ;;  %v554_v19 = vadd.f32 %v538_v57, %v373_v2  ;;  %v1373_v22 = vunpack.i.h.bf16 %v1986_v35  ;;  %v1372_v23 = vunpack.i.l.bf16 %v1986_v35 }
 0x100   : > { %v544_v36 = vmul.f32 %v1378_v3, %v1968_v10  ;;  %v543_v37 = vmul.f32 %v1377_v4, %v1968_v10 }
 0x101   : > { %v1386_v51 = vpop.permute.xlu1 %1385 }
 0x102   : > { %v1388_v54 = vunpack.i.h.bf16 %v1386_v51  ;;  %v1387_v55 = vunpack.i.l.bf16 %v1386_v51  ;;  %v1381_v56 = vpop.permute.xlu0 %1380 }
 0x103   : > { %v1383_v59 = vunpack.i.h.bf16 %v1381_v56  ;;  %v1382_v60 = vunpack.i.l.bf16 %v1381_v56 }
 0x104   : > { %v697_v63 = vmul.f32 %v1388_v54, %v1997_v50  ;;  %v696_v0 = vmul.f32 %v1387_v55, %v1997_v50 }
 0x105   : > { %v695_v5 = vmul.f32 %v1383_v59, %v1997_v50  ;;  %v694_v6 = vmul.f32 %v1382_v60, %v1997_v50  ;;  %v1396_v8 = vpop.permute.xlu1 %1395  ;;  %v559_v59 = vadd.f32 %v543_v37, %v378_v42 }
 0x106   : > { %v2009_v9 = vadd.f32 %v696_v0, %v547_v52  ;;  %v2011_v7 = vadd.f32 %v697_v63, %v548_v53  ;;  %v1398_v11 = vunpack.i.h.bf16 %v1396_v8  ;;  %v1397_v12 = vunpack.i.l.bf16 %v1396_v8  ;;  %v1391_v13 = vpop.permute.xlu0 %1390 }
 0x107   : > { %v2013_v14 = vadd.f32 %v694_v6, %v545_v44  ;;  %v2015_v15 = vadd.f32 %v695_v5, %v546_v45  ;;  %v1393_v16 = vunpack.i.h.bf16 %v1391_v13  ;;  %v1392_v17 = vunpack.i.l.bf16 %v1391_v13 }
 0x108   : > { %v701_v20 = vmul.f32 %v1398_v11, %v1997_v50  ;;  %v700_v21 = vmul.f32 %v1397_v12, %v1997_v50  ;;  %v542_v44 = vmul.f32 %v1373_v22, %v1968_v10  ;;  %v541_v45 = vmul.f32 %v1372_v23, %v1968_v10 }
 0x109   : > { %v699_v24 = vmul.f32 %v1393_v16, %v1997_v50  ;;  %v698_v25 = vmul.f32 %v1392_v17, %v1997_v50  ;;  %v1406_v26 = vpop.permute.xlu1 %1405  ;;  %v560_v10 = vadd.f32 %v544_v36, %v379_v43 }
 0x10a   : > { %v2023_v27 = vadd.f32 %v700_v21, %v551_v46  ;;  %v2025_v28 = vadd.f32 %v701_v20, %v552_v47  ;;  %v1408_v29 = vunpack.i.h.bf16 %v1406_v26  ;;  %v1407_v30 = vunpack.i.l.bf16 %v1406_v26  ;;  %v1401_v31 = vpop.permute.xlu0 %1400  ;;  %v376_v47 = vld [vmem:[%s1836_s22 + $0x60] sm:$0xff]  ;;  %s1633_s22 = smov 0  }
 0x10b   : > { %v714_v32 = vadd.f32 %v698_v25, %v549_v40  ;;  %v715_v33 = vadd.f32 %v699_v24, %v550_v41  ;;  %v1403_v34 = vunpack.i.h.bf16 %v1401_v31  ;;  %v1402_v35 = vunpack.i.l.bf16 %v1401_v31 }
 0x10c   : > { %v705_v38 = vmul.f32 %v1408_v29, %v1997_v50  ;;  %v704_v39 = vmul.f32 %v1407_v30, %v1997_v50  ;;  %v557_v0 = vadd.f32 %v541_v45, %v376_v47  ;;  %v558_v1 = vadd.f32 %v542_v44, %v377_v48 }
 0x10d   : > { %v703_v40 = vmul.f32 %v1403_v34, %v1997_v50  ;;  %v702_v41 = vmul.f32 %v1402_v35, %v1997_v50  ;;  %v1416_v46 = vpop.permute.xlu1 %1415 }
 0x10e   : > { %v2039_v49 = vadd.f32 %v704_v39, %v555_v61  ;;  %v2041_v51 = vadd.f32 %v705_v38, %v556_v62  ;;  %v1418_v52 = vunpack.i.h.bf16 %v1416_v46  ;;  %v1417_v53 = vunpack.i.l.bf16 %v1416_v46  ;;  %v1411_v54 = vpop.permute.xlu0 %1410 }
 0x10f   : > { %v718_v55 = vadd.f32 %v702_v41, %v553_v18  ;;  %v719_v56 = vadd.f32 %v703_v40, %v554_v19  ;;  %v1413_v57 = vunpack.i.h.bf16 %v1411_v54  ;;  %v1412_v58 = vunpack.i.l.bf16 %v1411_v54 }
 0x110   : > { %v709_v60 = vmul.f32 %v1418_v52, %v1997_v50  ;;  %v708_v63 = vmul.f32 %v1417_v53, %v1997_v50 }
 0x111   : > { %v707_v61 = vmul.f32 %v1413_v57, %v1997_v50  ;;  %v706_v62 = vmul.f32 %v1412_v58, %v1997_v50 }
 0x112   : > { %v724_v2 = vadd.f32 %v708_v63, %v559_v59  ;;  %v725_v3 = vadd.f32 %v709_v60, %v560_v10 }
 0x113   : > { %v722_v4 = vadd.f32 %v706_v62, %v557_v0  ;;  %v723_v5 = vadd.f32 %v707_v61, %v558_v1 }
 0x114 LB: >> { %1579 = dma.done.wait [#allocation3], 16  ;;  %s1635_s22 = sphi %s1633_s22, %s731_s22  }
 0x115   : >> { %1580 = vsyncadd [#allocation3], 4294967280  ;;  %s731_s22 = sadd.s32 1, %s1635_s22  }
 0x116   : >> { %p728_p6 = scmp.ge.s32.totalorder %s731_s22, 128  }
 0x117   : > { %v735_v6 = vld [vmem:[#allocation2] sm:$0xff] (%p728_p6)  ;;  %v737_v8 = vld [vmem:[#allocation2 + $0x10] sm:$0xff] (%p728_p6)  ;;  %v736_v11 = vld [vmem:[#allocation2 + $0x8] sm:$0xff] (%p728_p6)  ;;  %s1211_s17 = sshll.u32 (%p728_p6), %s1847_s8, 11  ;;  %s1022_s24 = sshll.u32 (%p728_p6), %s1856_s27, 4  ;;  %s2226_s24 = int_to_ptr.vmem [resolvable:$true] %s1022_s24 }
 0x118   : > { %730 = sbr.rel (!%p728_p6) target bundleno = 276 (0x114), region = 155  ;;  %v751_v12 = vadd.f32 (%p728_p6), %v735_v6, %v2013_v14  ;;  %v753_v50 = vadd.f32 (%p728_p6), %v737_v8, %v2009_v9  ;;  %v738_v13 = vld [vmem:[#allocation2 + $0x18] sm:$0xff] (%p728_p6)  ;;  %v752_v16 = vadd.f32 (%p728_p6), %v736_v11, %v2015_v15  ;;  %v739_v18 = vld [vmem:[#allocation2 + $0x20] sm:$0xff] (%p728_p6)  ;;  %v740_v19 = vld [vmem:[#allocation2 + $0x28] sm:$0xff] (%p728_p6)  ;;  %s2224_s12 = scalar_lea.hbm (%p728_p6), %s2300_s7, %s1211_s17 }
 0x119   : > { %v754_v17 = vadd.f32 (%p728_p6), %v738_v13, %v2011_v7  ;;  %v755_v20 = vadd.f32 (%p728_p6), %v739_v18, %v714_v32  ;;  %v756_v21 = vadd.f32 (%p728_p6), %v740_v19, %v715_v33  ;;  %v741_v22 = vld [vmem:[#allocation2 + $0x30] sm:$0xff] (%p728_p6)  ;;  %v742_v23 = vld [vmem:[#allocation2 + $0x38] sm:$0xff] (%p728_p6)  ;;  %v743_v24 = vld [vmem:[#allocation2 + $0x40] sm:$0xff] (%p728_p6)  ;;  %s2321_s8 = sand.u32 (%p728_p6), 1, %s1591_s0   ;;  %s1493_s3 = scalar_lea.vmem (%p728_p6), %s2226_s24, 2048 }
 0x11a   : > { %767 = vadd.xlane.f32.xlu0 (%p728_p6), %v751_v12  ;;  %771 = vadd.xlane.f32.xlu1 (%p728_p6), %v753_v50  ;;  %v757_v14 = vadd.f32 (%p728_p6), %v741_v22, %v2023_v27  ;;  %v758_v9 = vadd.f32 (%p728_p6), %v742_v23, %v2025_v28  ;;  %v744_v25 = vld [vmem:[#allocation2 + $0x48] sm:$0xff] (%p728_p6)  ;;  %v759_v15 = vadd.f32 (%p728_p6), %v743_v24, %v718_v55  ;;  %v745_v26 = vld [vmem:[#allocation2 + $0x50] sm:$0xff] (%p728_p6)  ;;  %v746_v29 = vld [vmem:[#allocation2 + $0x58] sm:$0xff] (%p728_p6)  ;;  %s2232_s16 = scalar_lea.sflag (%p728_p6), [#allocation8], %s2321_s8  ;;  %p1494_p9 = scmp.ne.s32.totalorder (%p728_p6), %s2226_s24, %s1493_s3 }
 0x11b   : > { %v2053_v7 = vadd.f32 (%p728_p6), %v744_v25, %v719_v56  ;;  %v2057_v30 = vadd.f32 (%p728_p6), %v745_v26, %v2039_v49  ;;  %v2060_v31 = vadd.f32 (%p728_p6), %v746_v29, %v2041_v51  ;;  %v747_v27 = vld [vmem:[#allocation2 + $0x60] sm:$0xff] (%p728_p6)  ;;  %v748_v28 = vld [vmem:[#allocation2 + $0x68] sm:$0xff] (%p728_p6)  ;;  %v749_v34 = vld [vmem:[#allocation2 + $0x70] sm:$0xff] (%p728_p6)  ;;  %p2322_p4 = scmp.ne.s32.totalorder (%p728_p6), %s2317_s23, 0  ;;  %s1643_s10 = smov (%p728_p6), [#allocation9]  }
 0x11c   : > { %v2064_v32 = vadd.f32 (%p728_p6), %v747_v27, %v722_v4  ;;  %v2066_v33 = vadd.f32 (%p728_p6), %v748_v28, %v723_v5  ;;  %v750_v35 = vld [vmem:[#allocation2 + $0x78] sm:$0xff] (%p728_p6)  ;;  %v2070_v36 = vadd.f32 (%p728_p6), %v749_v34, %v724_v2  ;;  %s1497_s13 = sshll.u32 (%p728_p6), %s1643_s10, 4  ;;  %s1498_s13 = int_to_ptr.vmem [resolvable:$false] %s1497_s13 }
 0x11d   : > { %v2072_v37 = vadd.f32 (%p728_p6), %v750_v35, %v725_v3  ;;  %p1495_p7 = pnand (%p728_p6), %p1494_p9, %p2322_p4  ;;  %s1499_s18 = scalar_lea.vmem (%p728_p6), %s1498_s13, 4096 }
 0x11e   : > { %769 = vadd.xlane.f32.xlu0 (%p728_p6), %v752_v16  ;;  %773 = vadd.xlane.f32.xlu1 (%p728_p6), %v754_v17  ;;  %p1500_p12 = scmp.lt.s32.totalorder (%p728_p6), %s2226_s24, %s1498_s13  ;;  %p1501_p8 = scmp.lt.s32.totalorder (%p728_p6), %s1499_s18, %s1493_s3 }
 0x11f   : > { %p1496_p10 = pneg %p1495_p7 }
 0x120   : > { %p1502_p1 = por %p1501_p8, %p1500_p12 }
 0x122   : > { %775 = vadd.xlane.f32.xlu0 %v755_v20  ;;  %777 = vadd.xlane.f32.xlu1 %v756_v21  ;;  %p1503_p2 = pnand %p1502_p1, %p1496_p10 }
 0x126   : > { %779 = vadd.xlane.f32.xlu0 %v757_v14  ;;  %781 = vadd.xlane.f32.xlu1 %v758_v9 }
 0x12a   : > { %783 = vadd.xlane.f32.xlu0 %v759_v15  ;;  %785 = vadd.xlane.f32.xlu1 %v2053_v7 }
 0x12e   : > { %787 = vadd.xlane.f32.xlu0 %v2057_v30  ;;  %789 = vadd.xlane.f32.xlu1 %v2060_v31 }
 0x132   : > { %791 = vadd.xlane.f32.xlu0 %v2064_v32  ;;  %793 = vadd.xlane.f32.xlu1 %v2066_v33 }
 0x136   : > { %795 = vadd.xlane.f32.xlu0 %v2070_v36  ;;  %797 = vadd.xlane.f32.xlu1 %v2072_v37 }
 0x1a7   : > { %v768_v38 = vpop.xlane.xlu0 %767  ;;  %v772_v39 = vpop.xlane.xlu1 %771 }
 0x1a8   : > { %v800_v42 = vmul.f32 0.0078125, %v768_v38  ;;  %v802_v43 = vmul.f32 0.0078125, %v772_v39 }
 0x1aa   : > { %v2076_v44 = vsub.f32 %v751_v12, %v800_v42  ;;  %v2078_v45 = vsub.f32 %v753_v50, %v802_v43 }
 0x1ab   : > { %v770_v40 = vpop.xlane.xlu0 %769  ;;  %v774_v41 = vpop.xlane.xlu1 %773 }
 0x1ac   : > { %v801_v46 = vmul.f32 0.0078125, %v770_v40  ;;  %v832_v47 = vmul.f32 %v2076_v44, %v2076_v44  ;;  %v803_v48 = vmul.f32 0.0078125, %v774_v41  ;;  %v834_v52 = vmul.f32 %v2078_v45, %v2078_v45 }
 0x1ae   : > { %v2082_v49 = vsub.f32 %v752_v16, %v801_v46  ;;  %848 = vadd.xlane.f32.xlu0 %v832_v47  ;;  %v2084_v51 = vsub.f32 %v754_v17, %v803_v48 }
 0x1af   : > { %v776_v53 = vpop.xlane.xlu0 %775  ;;  %v778_v54 = vpop.xlane.xlu1 %777 }
 0x1b0   : > { %v804_v55 = vmul.f32 0.0078125, %v776_v53  ;;  %v833_v56 = vmul.f32 %v2082_v49, %v2082_v49  ;;  %v805_v57 = vmul.f32 0.0078125, %v778_v54  ;;  %v835_v10 = vmul.f32 %v2084_v51, %v2084_v51 }
 0x1b2   : > { %v2090_v58 = vsub.f32 %v755_v20, %v804_v55  ;;  %852 = vadd.xlane.f32.xlu0 %v834_v52  ;;  %850 = vadd.xlane.f32.xlu1 %v833_v56  ;;  %v2092_v59 = vsub.f32 %v756_v21, %v805_v57 }
 0x1b3   : > { %v780_v60 = vpop.xlane.xlu0 %779  ;;  %v782_v63 = vpop.xlane.xlu1 %781 }
 0x1b4   : > { %v806_v0 = vmul.f32 0.0078125, %v780_v60  ;;  %v836_v1 = vmul.f32 %v2090_v58, %v2090_v58  ;;  %v807_v61 = vmul.f32 0.0078125, %v782_v63  ;;  %v837_v3 = vmul.f32 %v2092_v59, %v2092_v59 }
 0x1b6   : > { %v2098_v62 = vsub.f32 %v757_v14, %v806_v0  ;;  %854 = vadd.xlane.f32.xlu1 %v835_v10  ;;  %856 = vadd.xlane.f32.xlu0 %v836_v1  ;;  %v2100_v2 = vsub.f32 %v758_v9, %v807_v61  ;;  %v2150_v61 = vld [vmem:[%s2298_s5] ss:$0 sm:$0xff] }
 0x1b7   : > { %v784_v4 = vpop.xlane.xlu0 %783  ;;  %v786_v5 = vpop.xlane.xlu1 %785 }
 0x1b8   : > { %v808_v6 = vmul.f32 0.0078125, %v784_v4  ;;  %v838_v8 = vmul.f32 %v2098_v62, %v2098_v62  ;;  %v809_v11 = vmul.f32 0.0078125, %v786_v5  ;;  %v839_v13 = vmul.f32 %v2100_v2, %v2100_v2 }
 0x1ba   : > { %v2106_v12 = vsub.f32 %v759_v15, %v808_v6  ;;  %858 = vadd.xlane.f32.xlu1 %v837_v3  ;;  %860 = vadd.xlane.f32.xlu0 %v838_v8  ;;  %v2109_v50 = vsub.f32 %v2053_v7, %v809_v11  ;;  %v2156_v11 = vld [vmem:[%s2299_s6] ss:$0 sm:$0xff] }
 0x1bb   : > { %v788_v16 = vpop.xlane.xlu0 %787  ;;  %v790_v17 = vpop.xlane.xlu1 %789 }
 0x1bc   : > { %v810_v18 = vmul.f32 0.0078125, %v788_v16  ;;  %v840_v19 = vmul.f32 %v2106_v12, %v2106_v12  ;;  %v811_v20 = vmul.f32 0.0078125, %v790_v17  ;;  %v841_v23 = vmul.f32 %v2109_v50, %v2109_v50 }
 0x1be   : > { %v2116_v21 = vsub.f32 %v2057_v30, %v810_v18  ;;  %862 = vadd.xlane.f32.xlu1 %v839_v13  ;;  %864 = vadd.xlane.f32.xlu0 %v840_v19  ;;  %v2119_v22 = vsub.f32 %v2060_v31, %v811_v20 }
 0x1bf   : > { %v792_v14 = vpop.xlane.xlu0 %791  ;;  %v794_v9 = vpop.xlane.xlu1 %793 }
 0x1c0   : > { %v812_v24 = vmul.f32 0.0078125, %v792_v14  ;;  %v842_v25 = vmul.f32 %v2116_v21, %v2116_v21  ;;  %v813_v15 = vmul.f32 0.0078125, %v794_v9  ;;  %v843_v29 = vmul.f32 %v2119_v22, %v2119_v22 }
 0x1c2   : > { %v2126_v7 = vsub.f32 %v2064_v32, %v812_v24  ;;  %866 = vadd.xlane.f32.xlu1 %v841_v23  ;;  %868 = vadd.xlane.f32.xlu0 %v842_v25  ;;  %v2129_v26 = vsub.f32 %v2066_v33, %v813_v15 }
 0x1c3   : > { %v796_v30 = vpop.xlane.xlu0 %795  ;;  %v798_v31 = vpop.xlane.xlu1 %797 }
 0x1c4   : > { %v814_v27 = vmul.f32 0.0078125, %v796_v30  ;;  %v844_v28 = vmul.f32 %v2126_v7, %v2126_v7  ;;  %v815_v34 = vmul.f32 0.0078125, %v798_v31  ;;  %v845_v33 = vmul.f32 %v2129_v26, %v2129_v26 }
 0x1c6   : > { %v2136_v35 = vsub.f32 %v2070_v36, %v814_v27  ;;  %870 = vadd.xlane.f32.xlu1 %v843_v29  ;;  %872 = vadd.xlane.f32.xlu0 %v844_v28  ;;  %v2139_v32 = vsub.f32 %v2072_v37, %v815_v34 }
 0x1c8   : > { %v846_v38 = vmul.f32 %v2136_v35, %v2136_v35  ;;  %v847_v39 = vmul.f32 %v2139_v32, %v2139_v32 }
 0x1ca   : > { %874 = vadd.xlane.f32.xlu1 %v845_v33  ;;  %876 = vadd.xlane.f32.xlu0 %v846_v38 }
 0x1ce   : > { %878 = vadd.xlane.f32.xlu1 %v847_v39 }
 0x23b   : > { %v849_v42 = vpop.xlane.xlu0 %848 }
 0x23c   : > { %v880_v36 = vmul.f32 0.0078125, %v849_v42 }
 0x23e   : > { %v896_v43 = vadd.f32 1e-12, %v880_v36 }
 0x23f   : > { %v851_v40 = vpop.xlane.xlu1 %850  ;;  %v853_v41 = vpop.xlane.xlu0 %852 }
 0x240   : > { %1419 = vrsqrt.f32 %v896_v43  ;;  %v881_v37 = vmul.f32 0.0078125, %v851_v40  ;;  %v882_v46 = vmul.f32 0.0078125, %v853_v41 }
 0x242   : > { %v897_v47 = vadd.f32 1e-12, %v881_v37  ;;  %v898_v48 = vadd.f32 1e-12, %v882_v46 }
 0x243   : > { %v855_v52 = vpop.xlane.xlu1 %854  ;;  %v857_v53 = vpop.xlane.xlu0 %856 }
 0x244   : > { %1421 = vrsqrt.f32 %v897_v47  ;;  %v883_v54 = vmul.f32 0.0078125, %v855_v52  ;;  %v884_v55 = vmul.f32 0.0078125, %v857_v53 }
 0x245   : > { %1423 = vrsqrt.f32 %v898_v48 }
 0x246   : > { %v899_v56 = vadd.f32 1e-12, %v883_v54  ;;  %v900_v57 = vadd.f32 1e-12, %v884_v55 }
 0x247   : > { %v859_v10 = vpop.xlane.xlu1 %858  ;;  %v861_v60 = vpop.xlane.xlu0 %860 }
 0x248   : > { %1425 = vrsqrt.f32 %v899_v56  ;;  %v885_v63 = vmul.f32 0.0078125, %v859_v10  ;;  %v886_v0 = vmul.f32 0.0078125, %v861_v60 }
 0x249   : > { %1427 = vrsqrt.f32 %v900_v57 }
 0x24a   : > { %v1420_v1 = vpop.eup %1419  ;;  %v901_v3 = vadd.f32 1e-12, %v885_v63  ;;  %v902_v4 = vadd.f32 1e-12, %v886_v0 }
 0x24b   : > { %v928_v5 = vmul.f32 %v1420_v1, %v2076_v44  ;;  %v863_v6 = vpop.xlane.xlu1 %862  ;;  %v865_v8 = vpop.xlane.xlu0 %864 }
 0x24c   : > { %1429 = vrsqrt.f32 %v901_v3  ;;  %v887_v13 = vmul.f32 0.0078125, %v863_v6  ;;  %v888_v16 = vmul.f32 0.0078125, %v865_v8 }
 0x24d   : > { %v951_v17 = vmul.f32 %v2150_v61, %v928_v5  ;;  %1431 = vrsqrt.f32 %v902_v4 }
 0x24e   : > { %v1422_v18 = vpop.eup %1421  ;;  %v903_v19 = vadd.f32 1e-12, %v887_v13  ;;  %v904_v20 = vadd.f32 1e-12, %v888_v16 }
 0x24f   : > { %v1424_v23 = vpop.eup %1423  ;;  %v974_v44 = vadd.f32 %v2156_v11, %v951_v17  ;;  %v929_v14 = vmul.f32 %v1422_v18, %v2082_v49  ;;  %v867_v9 = vpop.xlane.xlu1 %866 }
 0x250   : > { %v869_v24 = vpop.xlane.xlu0 %868  ;;  %v930_v25 = vmul.f32 %v1424_v23, %v2078_v45  ;;  %1433 = vrsqrt.f32 %v903_v19  ;;  %v889_v15 = vmul.f32 0.0078125, %v867_v9 }
 0x251   : > { %v890_v29 = vmul.f32 0.0078125, %v869_v24  ;;  %990 = vst [vmem:[%s1856_s27] sm:$0xff] %v974_v44  ;;  %v952_v30 = vmul.f32 %v2150_v61, %v929_v14  ;;  %1435 = vrsqrt.f32 %v904_v20 }
 0x252   : > { %v1426_v31 = vpop.eup %1425  ;;  %v953_v27 = vmul.f32 %v2150_v61, %v930_v25  ;;  %v905_v28 = vadd.f32 1e-12, %v889_v15 }
 0x253   : > { %v906_v34 = vadd.f32 1e-12, %v890_v29  ;;  %v1428_v33 = vpop.eup %1427  ;;  %v975_v49 = vadd.f32 %v2156_v11, %v952_v30  ;;  %v931_v38 = vmul.f32 %v1426_v31, %v2084_v51  ;;  %v871_v45 = vpop.xlane.xlu1 %870 }
 0x254   : > { %v873_v39 = vpop.xlane.xlu0 %872  ;;  %v976_v42 = vadd.f32 %v2156_v11, %v953_v27  ;;  %v932_v36 = vmul.f32 %v1428_v33, %v2090_v58  ;;  %1437 = vrsqrt.f32 %v905_v28  ;;  %v891_v43 = vmul.f32 0.0078125, %v871_v45 }
 0x255   : > { %991 = vst [vmem:[%s1856_s27 + $0x8] sm:$0xff] %v975_v49  ;;  %v954_v40 = vmul.f32 %v2150_v61, %v931_v38  ;;  %1439 = vrsqrt.f32 %v906_v34  ;;  %v892_v41 = vmul.f32 0.0078125, %v873_v39 }
 0x256   : > { %v1430_v37 = vpop.eup %1429  ;;  %992 = vst [vmem:[%s1856_s27 + $0x10] sm:$0xff] %v976_v42  ;;  %v955_v46 = vmul.f32 %v2150_v61, %v932_v36  ;;  %v907_v47 = vadd.f32 1e-12, %v891_v43 }
 0x257   : > { %v1432_v51 = vpop.eup %1431  ;;  %v977_v48 = vadd.f32 %v2156_v11, %v954_v40  ;;  %v933_v52 = vmul.f32 %v1430_v37, %v2092_v59  ;;  %v908_v58 = vadd.f32 1e-12, %v892_v41  ;;  %v875_v53 = vpop.xlane.xlu1 %874 }
 0x258   : > { %v877_v54 = vpop.xlane.xlu0 %876  ;;  %v978_v55 = vadd.f32 %v2156_v11, %v955_v46  ;;  %v934_v56 = vmul.f32 %v1432_v51, %v2098_v62  ;;  %1441 = vrsqrt.f32 %v907_v47  ;;  %v893_v57 = vmul.f32 0.0078125, %v875_v53 }
 0x259   : > { %993 = vst [vmem:[%s1856_s27 + $0x18] sm:$0xff] %v977_v48  ;;  %v956_v10 = vmul.f32 %v2150_v61, %v933_v52  ;;  %1443 = vrsqrt.f32 %v908_v58  ;;  %v894_v60 = vmul.f32 0.0078125, %v877_v54 }
 0x25a   : > { %v1434_v63 = vpop.eup %1433  ;;  %994 = vst [vmem:[%s1856_s27 + $0x20] sm:$0xff] %v978_v55  ;;  %v957_v59 = vmul.f32 %v2150_v61, %v934_v56  ;;  %v909_v0 = vadd.f32 1e-12, %v893_v57 }
 0x25b   : > { %v1436_v1 = vpop.eup %1435  ;;  %v979_v3 = vadd.f32 %v2156_v11, %v956_v10  ;;  %v935_v4 = vmul.f32 %v1434_v63, %v2100_v2  ;;  %v910_v62 = vadd.f32 1e-12, %v894_v60  ;;  %v879_v5 = vpop.xlane.xlu1 %878 }
 0x25c   : > { %v980_v6 = vadd.f32 %v2156_v11, %v957_v59  ;;  %v936_v8 = vmul.f32 %v1436_v1, %v2106_v12  ;;  %1445 = vrsqrt.f32 %v909_v0  ;;  %v895_v13 = vmul.f32 0.0078125, %v879_v5 }
 0x25d   : > { %995 = vst [vmem:[%s1856_s27 + $0x28] sm:$0xff] %v979_v3  ;;  %v958_v16 = vmul.f32 %v2150_v61, %v935_v4  ;;  %1447 = vrsqrt.f32 %v910_v62 }
 0x25e   : > { %v1438_v17 = vpop.eup %1437  ;;  %996 = vst [vmem:[%s1856_s27 + $0x30] sm:$0xff] %v980_v6  ;;  %v959_v18 = vmul.f32 %v2150_v61, %v936_v8  ;;  %v911_v19 = vadd.f32 1e-12, %v895_v13 }
 0x25f   : > { %v1440_v2 = vpop.eup %1439  ;;  %v981_v20 = vadd.f32 %v2156_v11, %v958_v16  ;;  %v937_v23 = vmul.f32 %v1438_v17, %v2109_v50 }
 0x260   : > { %v982_v12 = vadd.f32 %v2156_v11, %v959_v18  ;;  %v938_v44 = vmul.f32 %v1440_v2, %v2116_v21  ;;  %1449 = vrsqrt.f32 %v911_v19 }
 0x261   : > { %997 = vst [vmem:[%s1856_s27 + $0x38] sm:$0xff] %v981_v20  ;;  %v960_v14 = vmul.f32 %v2150_v61, %v937_v23 }
 0x262   : > { %v1442_v9 = vpop.eup %1441  ;;  %998 = vst [vmem:[%s1856_s27 + $0x40] sm:$0xff] %v982_v12  ;;  %v961_v24 = vmul.f32 %v2150_v61, %v938_v44 }
 0x263   : > { %v1444_v25 = vpop.eup %1443  ;;  %v983_v15 = vadd.f32 %v2156_v11, %v960_v14  ;;  %v939_v29 = vmul.f32 %v1442_v9, %v2119_v22 }
 0x264   : > { %v984_v50 = vadd.f32 %v2156_v11, %v961_v24  ;;  %v940_v30 = vmul.f32 %v1444_v25, %v2126_v7 }
 0x265   : > { %999 = vst [vmem:[%s1856_s27 + $0x48] sm:$0xff] %v983_v15  ;;  %v962_v21 = vmul.f32 %v2150_v61, %v939_v29 }
 0x266   : > { %v1446_v31 = vpop.eup %1445  ;;  %1000 = vst [vmem:[%s1856_s27 + $0x50] sm:$0xff] %v984_v50  ;;  %v963_v27 = vmul.f32 %v2150_v61, %v940_v30 }
 0x267   : > { %v1448_v28 = vpop.eup %1447  ;;  %v985_v34 = vadd.f32 %v2156_v11, %v962_v21  ;;  %v941_v22 = vmul.f32 %v1446_v31, %v2129_v26 }
 0x268   : > { %v986_v33 = vadd.f32 %v2156_v11, %v963_v27  ;;  %v942_v7 = vmul.f32 %v1448_v28, %v2136_v35 }
 0x269   : > { %1001 = vst [vmem:[%s1856_s27 + $0x58] sm:$0xff] %v985_v34  ;;  %v964_v49 = vmul.f32 %v2150_v61, %v941_v22 }
 0x26a   : > { %v1450_v38 = vpop.eup %1449  ;;  %1002 = vst [vmem:[%s1856_s27 + $0x60] sm:$0xff] %v986_v33  ;;  %v965_v45 = vmul.f32 %v2150_v61, %v942_v7 }
 0x26b   : > { %v987_v39 = vadd.f32 %v2156_v11, %v964_v49  ;;  %v943_v42 = vmul.f32 %v1450_v38, %v2139_v32 }
 0x26c   : > { %v988_v26 = vadd.f32 %v2156_v11, %v965_v45 }
 0x26d   : > { %1003 = vst [vmem:[%s1856_s27 + $0x68] sm:$0xff] %v987_v39  ;;  %v966_v35 = vmul.f32 %v2150_v61, %v943_v42 }
 0x26e   : > { %1004 = vst [vmem:[%s1856_s27 + $0x70] sm:$0xff] %v988_v26 }
 0x26f   : > { %v989_v32 = vadd.f32 %v2156_v11, %v966_v35 }
 0x271   : > { %1005 = vst [vmem:[%s1856_s27 + $0x78] sm:$0xff] %v989_v32 }
 0x272   : > { %1506 = shalt.err (!%p1503_p2)
}
 0x273   : > { %s1507_s27 = scalar_lea.hbm %s2224_s12, 2048  ;;  %s1511_s28 = scalar_lea.hbm %s2300_s7, 8192 }
 0x274   : > { %p1508_p11 = scmp.ne.s32.totalorder %s2224_s12, %s1507_s27  ;;  %p1512_p5 = scmp.lt.u32.totalorder %s2224_s12, %s2300_s7 }
 0x275   : > { %p1513_p13 = scmp.lt.u32.totalorder %s1511_s28, %s1507_s27  ;;  %p1515_p9 = scmp.lt.u32.totalorder %s1507_s27, %s2224_s12 }
 0x276   : > { %p1509_p0 = pnand %p1508_p11, %p2322_p4 }
 0x277   : > { %p1514_p6 = por %p1513_p13, %p1512_p5 }
 0x278   : > { %p1510_p3 = pneg %p1509_p0 }
 0x279   : > { %p1516_p7 = por %p1515_p9, %p1514_p6 }
 0x27b   : > { %p1517_p10 = pnand %p1516_p7, %p1510_p3 }
 0x27d   : > { %1520 = shalt.err (!%p1517_p10)
}
 0x27e   : > { %s1644_s17 = smov 128   ;;  %s1645_s25 = smov 8  }
 0x27f   : > { %1214 = dma.vmem_to_hbm [thread:$0]  (%p2322_p4), %s2226_s24, 2048, %s2224_s12, %s2232_s16, %s1644_s17, %s1644_s17, %s1645_s25  }
 0x280 PF: > { %p1225_p12 = scmp.ge.s32.totalorder %s1627_s15, 2  ;;  %s1037_s11 = sand.u32 1, %s1587_s29  }
 0x281   : > { %p2323_p8 = scmp.ne.s32.totalorder %s2318_s14, 0  ;;  %s1038_s8 = scalar_lea.sflag [#allocation8], %s1037_s11 }
 0x283   : > { %p1221_p1 = pnand %p1225_p12, %p2323_p8 }
 0x285   : > { %1582 = dma.done.wait (!%p1221_p1), %s1038_s8, 2048  }
 0x286   : > { %1584 = vsyncadd (!%p1221_p1), %s1038_s8, 4294965248  ;;  %s29_s15 = sadd.s32 1, %s1627_s15   ;;  %s2324_s23 = sld [smem:[#allocation15_spill]] }
 0x287   : > { %p26_p2 = scmp.ge.s32.totalorder %s29_s15, 6   ;;  %s2325_s10 = sld [smem:[#allocation20_spill]] }
 0x288   : > { %s2326_s11 = sld [smem:[#allocation16_spill]]  ;;  %s2327_s12 = sld [smem:[#allocation17_spill]] }
 0x289   : > { %s2328_s13 = sld [smem:[#allocation18_spill]]  ;;  %s2329_s14 = sld [smem:[#allocation19_spill]] }
 0x28a   : > { %s2330_s29 = smov %s1591_s0  ;;  %s2331_s0 = smov %s1595_s30 }
 0x28b   : > { %s2332_s30 = smov %s1779_s20  ;;  %s2333_s8 = smov %s1603_s9 }
 0x28c   : > { %s2334_s9 = smov %s2324_s23  ;;  %28 = sbr.rel (!%p26_p2) target bundleno = 24 (0x18), region = 166 }
 0x293   :  { %1043 = vsyncpa [#allocation7], 1 }
 0x294   :  { %1045 = vsyncpa [#allocation7 + $0x1], 1 }
 0x295   :  { %1046 = vsyncpa [#allocation8], 1 }
 0x296   :  { %1048 = vsyncpa [#allocation8 + $0x1], 1 }
 0x297   :  { %1049 = vsyncmov [#allocation3] }
 0x29a   :  { %s1050_s20 = vpop.sfrf %1049 }
 0x29b   :  { %p1209_p4 = scmp.ne.s32.totalorder %s1050_s20, 0 }
 0x29d   :  { %1054 = shalt.err (%p1209_p4)  }

</bundles_post_ra>
